<compile_context>
chip_gen: v6e
topology: v6e:2x2x1
jax: 0.10.0
libtpu: 0.0.40
codegen_flags: <defaults>
</compile_context>

<pallas_src>
import jax
import jax.numpy as jnp
from jax.experimental import pallas as pl
from jax.experimental.pallas import tpu as pltpu


HIDDEN = 64                    # logical hidden size (matches the PyTorch module)
LANE = 128                     # TPU lane width; hidden dim is padded to this
VMEM_TILE_BUDGET = 32 << 20    # conservative budget for tiles + weights (all gens)


def ffnn_kernel(x_ref, w1_ref, b1_ref, w2_ref, b2_ref, w3_ref, b3_ref, o_ref):
    # All three matmuls + ReLUs fused; activations never leave VMEM/vregs.
    x = x_ref[...].astype(jnp.bfloat16)                   # in-kernel cast (VPU, free)
    h1 = jnp.dot(x, w1_ref[...], preferred_element_type=jnp.float32) + b1_ref[...]
    h1 = jnp.maximum(h1, 0.0).astype(jnp.bfloat16)        # (tm, Hp) -> bf16 for MXU
    h2 = jnp.dot(h1, w2_ref[...], preferred_element_type=jnp.float32) + b2_ref[...]
    h2 = jnp.maximum(h2, 0.0).astype(jnp.bfloat16)        # (tm, Hp) -> bf16 for MXU
    out = jnp.dot(h2, w3_ref[...], preferred_element_type=jnp.float32) + b3_ref[...]
    o_ref[...] = out.astype(o_ref.dtype)                  # (tm, D) unpadded store


def _weight_vmem_bytes(d, h_pad):
    """VMEM for the (default double-buffered) resident weights + biases."""
    return 2 * ((d * h_pad + h_pad * h_pad + h_pad * d) * 2   # bf16 weights
                + (2 * h_pad + d) * 4)                        # f32 biases


def _choose_tm(batch, d, h_pad):
    """Batch tile from a VMEM budget; multiple of 8; >=4 grid steps if possible."""
    per_row = 2 * d * 4 + 2 * d * 4            # f32 x + f32 out, double-buffered
    avail = max(VMEM_TILE_BUDGET - _weight_vmem_bytes(d, h_pad), 8 * per_row)
    tm = min(batch, 1024, avail // per_row)
    # >= 4 grid steps when the batch permits: >= 2 steps per TensorCore after
    # megacore sharding on v7x, so each core keeps cross-step DMA/compute overlap.
    if batch >= 32:
        tm = min(tm, pl.cdiv(batch, 4))
    return max(8, (int(tm) // 8) * 8)


def _prepare_params(params, h_pad):
    """Pad the hidden dim to h_pad, cast weights to bf16 (biases stay f32).

    ReLU(0)=0 and zero weight rows/cols keep the real columns bit-identical.
    The output dim of w3/b3 is deliberately NOT padded (unpadded (B, D) store).
    """
    d_in, h = params["w1"].shape
    bf = jnp.bfloat16

    w1 = jnp.zeros((d_in, h_pad), bf).at[:, :h].set(params["w1"].astype(bf))
    b1 = jnp.zeros((1, h_pad), jnp.float32).at[0, :h].set(params["b1"])
    w2 = jnp.zeros((h_pad, h_pad), bf).at[:h, :h].set(params["w2"].astype(bf))
    b2 = jnp.zeros((1, h_pad), jnp.float32).at[0, :h].set(params["b2"])
    w3 = jnp.zeros((h_pad, d_in), bf).at[:h, :].set(params["w3"].astype(bf))
    b3 = params["b3"].astype(jnp.float32).reshape(1, d_in)
    return w1, b1, w2, b2, w3, b3


def ffnn_forward(x, params, *, tm=None):
    """x: (B, D) float32. params: dict of w1,b1,w2,b2,w3,b3 (weights as (in,out))."""
    B, D = x.shape
    H = params["w1"].shape[1]
    H_pad = max(LANE, pl.cdiv(H, LANE) * LANE)

    if tm is None:
        tm = _choose_tm(B, D, H_pad)
    grid = (pl.cdiv(B, tm),)

    w1, b1, w2, b2, w3, b3 = _prepare_params(params, H_pad)

    # VMEM sizing -> explicit scoped-VMEM limit (headroom, capped for v7x's
    # 64 MiB physical VMEM; v5e/v6e have 128 MiB so 48 MiB is always safe).
    weight_bytes = _weight_vmem_bytes(D, H_pad)
    tile_bytes = 2 * (tm * D * 4) + 2 * (tm * D * 4)
    vmem_need = weight_bytes + tile_bytes
    vmem_limit = int(min(max(vmem_need + vmem_need // 2 + (2 << 20), 16 << 20),
                         48 << 20))

    # Advisory cost hint matching the real DMA footprint (f32 in, f32 out).
    flops = 2 * B * (D * H + H * H + H * D)
    bytes_accessed = (
        B * D * 4                                          # x (f32)
        + B * D * 4                                        # out (f32, unpadded)
        + (D * H_pad + H_pad * H_pad + H_pad * D) * 2      # bf16 weights
        + (2 * H_pad + D) * 4                              # f32 biases
    )

    return pl.pallas_call(
        ffnn_kernel,
        out_shape=jax.ShapeDtypeStruct((B, D), jnp.float32),
        grid_spec=pltpu.PrefetchScalarGridSpec(
            num_scalar_prefetch=0,
            grid=grid,
            in_specs=[
                pl.BlockSpec((tm, D), lambda i: (i, 0)),         # x tile (f32)
                pl.BlockSpec((D, H_pad), lambda i: (0, 0)),      # w1 (resident)
                pl.BlockSpec((1, H_pad), lambda i: (0, 0)),      # b1
                pl.BlockSpec((H_pad, H_pad), lambda i: (0, 0)),  # w2
                pl.BlockSpec((1, H_pad), lambda i: (0, 0)),      # b2
                pl.BlockSpec((H_pad, D), lambda i: (0, 0)),      # w3 (rows padded only)
                pl.BlockSpec((1, D), lambda i: (0, 0)),          # b3
            ],
            out_specs=pl.BlockSpec((tm, D), lambda i: (i, 0)),   # unpadded out tile
        ),
        compiler_params=pltpu.CompilerParams(
            dimension_semantics=("parallel",),
            vmem_limit_bytes=vmem_limit,
        ),
        cost_estimate=pl.CostEstimate(
            flops=flops, transcendentals=0, bytes_accessed=bytes_accessed),
    )(x, w1, b1, w2, b2, w3, b3)


def init_params(key, input_dim, hidden=HIDDEN):
    """Deterministic init matching PyTorch nn.Linear shapes.
    PyTorch weight is (out, in); we store the transpose (in, out)."""
    ks = jax.random.split(key, 6)

    def linear(kw, kb, fan_in, fan_out):
        bound = 1.0 / jnp.sqrt(fan_in)
        w = jax.random.uniform(kw, (fan_in, fan_out), jnp.float32, -bound, bound)
        b = jax.random.uniform(kb, (fan_out,), jnp.float32, -bound, bound)
        return w, b

    w1, b1 = linear(ks[0], ks[1], input_dim, hidden)
    w2, b2 = linear(ks[2], ks[3], hidden, hidden)
    w3, b3 = linear(ks[4], ks[5], hidden, input_dim)
    return {"w1": w1, "b1": b1, "w2": w2, "b2": b2, "w3": w3, "b3": b3}


def ffnn_ref_f32(x, p):
    h = jnp.maximum(x @ p["w1"] + p["b1"], 0.0)
    h = jnp.maximum(h @ p["w2"] + p["b2"], 0.0)
    return h @ p["w3"] + p["b3"]


def ffnn_ref_bf16(x, p):
    """Reference mirroring the kernel's bf16-input / f32-accumulate path."""
    def q(a):
        return a.astype(jnp.bfloat16).astype(jnp.float32)
    h = jnp.maximum(q(x) @ q(p["w1"]) + p["b1"], 0.0)
    h = jnp.maximum(q(h) @ q(p["w2"]) + p["b2"], 0.0)
    return q(h) @ q(p["w3"]) + p["b3"]


if __name__ == "__main__":
    key = jax.random.PRNGKey(0)
    k_param, k_x, k_x2 = jax.random.split(key, 3)

    batch, input_dim = 256, 32   # 4-step grid at these shapes
    params = init_params(k_param, input_dim)
    x = jax.random.normal(k_x, (batch, input_dim), jnp.float32)

    out = ffnn_forward(x, params)
    out = jax.block_until_ready(out)
    assert out.shape == (batch, input_dim)

    # Tight check against a reference applying the same bf16 quantization.
    ref_q = ffnn_ref_bf16(x, params)
    assert jnp.allclose(out, ref_q, atol=1e-4, rtol=1e-4), \
        float(jnp.max(jnp.abs(out - ref_q)))

    # Loose check against the pure-f32 reference (module semantics).
    ref = ffnn_ref_f32(x, params)
    assert jnp.allclose(out, ref, atol=5e-2, rtol=5e-2), \
        float(jnp.max(jnp.abs(out - ref)))

    # Ragged batch (not a multiple of the tile): exercises the masked last block.
    x2 = jax.random.normal(k_x2, (50, input_dim), jnp.float32)
    out2 = jax.block_until_ready(ffnn_forward(x2, params))
    ref2_q = ffnn_ref_bf16(x2, params)
    assert out2.shape == (50, input_dim)
    assert jnp.allclose(out2, ref2_q, atol=1e-4, rtol=1e-4), \
        float(jnp.max(jnp.abs(out2 - ref2_q)))

    print("KERNEL_OK")
</pallas_src>

<mosaic_0001>
module attributes {stable_mosaic.version = 11 : i64} {
  func.func @ffnn_kernel(%arg0: i32, %arg1: memref<64x32xf32, #tpu.memory_space<vmem>>, %arg2: memref<32x128xbf16, #tpu.memory_space<vmem>>, %arg3: memref<1x128xf32, #tpu.memory_space<vmem>>, %arg4: memref<128x128xbf16, #tpu.memory_space<vmem>>, %arg5: memref<1x128xf32, #tpu.memory_space<vmem>>, %arg6: memref<128x32xbf16, #tpu.memory_space<vmem>>, %arg7: memref<1x32xf32, #tpu.memory_space<vmem>>, %arg8: memref<64x32xf32, #tpu.memory_space<vmem>>) attributes {dimension_semantics = [#tpu.dimension_semantics<parallel>], iteration_bounds = array<i64: 4>, scalar_prefetch = 0 : i64, scratch_operands = 0 : i64, tpu.core_type = #tpu.core_type<tc>, window_params = [{transform_indices = @transform_0, window_bounds = array<i64: 64, 32>}, {pipeline_mode = #tpu.pipeline_mode<synchronous>, transform_indices = @transform_1, window_bounds = array<i64: 32, 128>}, {pipeline_mode = #tpu.pipeline_mode<synchronous>, transform_indices = @transform_2, window_bounds = array<i64: 1, 128>}, {pipeline_mode = #tpu.pipeline_mode<synchronous>, transform_indices = @transform_3, window_bounds = array<i64: 128, 128>}, {pipeline_mode = #tpu.pipeline_mode<synchronous>, transform_indices = @transform_4, window_bounds = array<i64: 1, 128>}, {pipeline_mode = #tpu.pipeline_mode<synchronous>, transform_indices = @transform_5, window_bounds = array<i64: 128, 32>}, {pipeline_mode = #tpu.pipeline_mode<synchronous>, transform_indices = @transform_6, window_bounds = array<i64: 1, 32>}, {transform_indices = @transform_7, window_bounds = array<i64: 64, 32>}]} {
    %c0 = arith.constant 0 : index
    %c0_0 = arith.constant 0 : index
    %0 = vector.load %arg1[%c0, %c0_0] : memref<64x32xf32, #tpu.memory_space<vmem>>, vector<64x32xf32>
    %1 = arith.truncf %0 : vector<64x32xf32> to vector<64x32xbf16>
    %c0_1 = arith.constant 0 : index
    %c0_2 = arith.constant 0 : index
    %2 = vector.load %arg2[%c0_1, %c0_2] : memref<32x128xbf16, #tpu.memory_space<vmem>>, vector<32x128xbf16>
    %cst = arith.constant dense<0.000000e+00> : vector<64x128xf32>
    %3 = tpu.matmul %1, %2, %cst {dimension_numbers = #tpu.dot_dimension_numbers<[1], [0], [0], [1], [0, 0, 1, 1], [], []>} : vector<64x32xbf16>, vector<32x128xbf16>, vector<64x128xf32> -> vector<64x128xf32>
    %c0_3 = arith.constant 0 : index
    %c0_4 = arith.constant 0 : index
    %4 = vector.load %arg3[%c0_3, %c0_4] : memref<1x128xf32, #tpu.memory_space<vmem>>, vector<1x128xf32>
    %5 = vector.broadcast %4 : vector<1x128xf32> to vector<64x128xf32>
    %6 = arith.addf %3, %5 : vector<64x128xf32>
    %cst_5 = arith.constant 0.000000e+00 : f32
    %7 = vector.broadcast %cst_5 : f32 to vector<64x128xf32>
    %8 = arith.maximumf %6, %7 : vector<64x128xf32>
    %9 = arith.truncf %8 : vector<64x128xf32> to vector<64x128xbf16>
    %c0_6 = arith.constant 0 : index
    %c0_7 = arith.constant 0 : index
    %10 = vector.load %arg4[%c0_6, %c0_7] : memref<128x128xbf16, #tpu.memory_space<vmem>>, vector<128x128xbf16>
    %cst_8 = arith.constant dense<0.000000e+00> : vector<64x128xf32>
    %11 = tpu.matmul %9, %10, %cst_8 {dimension_numbers = #tpu.dot_dimension_numbers<[1], [0], [0], [1], [0, 0, 1, 1], [], []>} : vector<64x128xbf16>, vector<128x128xbf16>, vector<64x128xf32> -> vector<64x128xf32>
    %c0_9 = arith.constant 0 : index
    %c0_10 = arith.constant 0 : index
    %12 = vector.load %arg5[%c0_9, %c0_10] : memref<1x128xf32, #tpu.memory_space<vmem>>, vector<1x128xf32>
    %13 = vector.broadcast %12 : vector<1x128xf32> to vector<64x128xf32>
    %14 = arith.addf %11, %13 : vector<64x128xf32>
    %cst_11 = arith.constant 0.000000e+00 : f32
    %15 = vector.broadcast %cst_11 : f32 to vector<64x128xf32>
    %16 = arith.maximumf %14, %15 : vector<64x128xf32>
    %17 = arith.truncf %16 : vector<64x128xf32> to vector<64x128xbf16>
    %c0_12 = arith.constant 0 : index
    %c0_13 = arith.constant 0 : index
    %18 = vector.load %arg6[%c0_12, %c0_13] : memref<128x32xbf16, #tpu.memory_space<vmem>>, vector<128x32xbf16>
    %cst_14 = arith.constant dense<0.000000e+00> : vector<64x32xf32>
    %19 = tpu.matmul %17, %18, %cst_14 {dimension_numbers = #tpu.dot_dimension_numbers<[1], [0], [0], [1], [0, 0, 1, 1], [], []>} : vector<64x128xbf16>, vector<128x32xbf16>, vector<64x32xf32> -> vector<64x32xf32>
    %c0_15 = arith.constant 0 : index
    %c0_16 = arith.constant 0 : index
    %20 = vector.load %arg7[%c0_15, %c0_16] : memref<1x32xf32, #tpu.memory_space<vmem>>, vector<1x32xf32>
    %21 = vector.broadcast %20 : vector<1x32xf32> to vector<64x32xf32>
    %22 = arith.addf %19, %21 : vector<64x32xf32>
    %c0_17 = arith.constant 0 : index
    %c0_18 = arith.constant 0 : index
    %23 = vector.load %arg8[%c0_17, %c0_18] : memref<64x32xf32, #tpu.memory_space<vmem>>, vector<64x32xf32>
    tpu.vector_store %arg8[%c0_17, %c0_18], %22 {strides = array<i32>} : memref<64x32xf32, #tpu.memory_space<vmem>>, vector<64x32xf32>,
    return
  }
  func.func @transform_0(%arg0: i32) -> (i32, i32) {
    %c0_i32 = arith.constant 0 : i32
    %c0_i32_0 = arith.constant 0 : i32
    return %arg0, %c0_i32 : i32, i32
  }
  func.func @transform_1(%arg0: i32) -> (i32, i32) {
    %c0_i32 = arith.constant 0 : i32
    %c0_i32_0 = arith.constant 0 : i32
    %c0_i32_1 = arith.constant 0 : i32
    return %c0_i32, %c0_i32_0 : i32, i32
  }
  func.func @transform_2(%arg0: i32) -> (i32, i32) {
    %c0_i32 = arith.constant 0 : i32
    %c0_i32_0 = arith.constant 0 : i32
    %c0_i32_1 = arith.constant 0 : i32
    return %c0_i32, %c0_i32_0 : i32, i32
  }
  func.func @transform_3(%arg0: i32) -> (i32, i32) {
    %c0_i32 = arith.constant 0 : i32
    %c0_i32_0 = arith.constant 0 : i32
    %c0_i32_1 = arith.constant 0 : i32
    return %c0_i32, %c0_i32_0 : i32, i32
  }
  func.func @transform_4(%arg0: i32) -> (i32, i32) {
    %c0_i32 = arith.constant 0 : i32
    %c0_i32_0 = arith.constant 0 : i32
    %c0_i32_1 = arith.constant 0 : i32
    return %c0_i32, %c0_i32_0 : i32, i32
  }
  func.func @transform_5(%arg0: i32) -> (i32, i32) {
    %c0_i32 = arith.constant 0 : i32
    %c0_i32_0 = arith.constant 0 : i32
    %c0_i32_1 = arith.constant 0 : i32
    return %c0_i32, %c0_i32_0 : i32, i32
  }
  func.func @transform_6(%arg0: i32) -> (i32, i32) {
    %c0_i32 = arith.constant 0 : i32
    %c0_i32_0 = arith.constant 0 : i32
    %c0_i32_1 = arith.constant 0 : i32
    return %c0_i32, %c0_i32_0 : i32, i32
  }
  func.func @transform_7(%arg0: i32) -> (i32, i32) {
    %c0_i32 = arith.constant 0 : i32
    %c0_i32_0 = arith.constant 0 : i32
    return %arg0, %c0_i32 : i32, i32
  }
}

</mosaic_0001>

<bundles_post_ra>
// kernel: tpu_custom_call.1
= control target key start
LH: loop header
LB: loop body
LE: loop exit
PB: predicated region body
PF: predicated region fallthrough
CT: control target
= control target key end

     0   :  { %s956_s24 = smov 0   ;;  %s1055_s0 = inlined_call_operand.vmem [shape: f32[256,32], index: 0, kind: input, shape index: {}]   ;;  %s1056_s1 = inlined_call_operand.vmem [shape: bf16[32,128], index: 1, kind: input, shape index: {}]   ;;  %s1057_s2 = inlined_call_operand.vmem [shape: f32[1,128], index: 2, kind: input, shape index: {}]   ;;  %s1058_s3 = inlined_call_operand.vmem [shape: bf16[128,128], index: 3, kind: input, shape index: {}]   ;;  %s1059_s4 = inlined_call_operand.vmem [shape: f32[1,128], index: 4, kind: input, shape index: {}]   ;;  %s1060_s5 = inlined_call_operand.vmem [shape: bf16[128,32], index: 5, kind: input, shape index: {}]   ;;  %s1061_s6 = inlined_call_operand.vmem [shape: f32[1,32], index: 6, kind: input, shape index: {}]   ;;  %s1062_s7 = inlined_call_operand.vmem [shape: f32[256,32], index: 7, kind: output, shape index: {}]  }
   0x1 LB: > { %s756_s25 = sadd.s32 4294967295, %s914_s24   ;;  %p760_p0 = scmp.ge.s32.totalorder %s914_s24, 1  ;;  %s914_s24 = sphi %s956_s24, %s17_s24  }
   0x2   : > { %p238_p1 = scmp.lt.s32.totalorder %s914_s24, 5 }
   0x4   : > { %p239_p2 = pnand %p760_p0, %p238_p1 }
   0x5   : > { %s761_s28 = sshll.u32 (!%p239_p2), %s756_s25, 3 }
   0x6   : > { %242 = sbr.rel (%p239_p2) target bundleno = 642 (0x282), region = 48  ;;  %p271_p3 = scmp.lt.s32.totalorder (!%p239_p2), %s761_s28, 31 }
   0xb   : > { %v890_v0 = vld [vmem:[%s1056_s1 + $0x8] sm:$0xff]   ;;  %v891_v1 = vld [vmem:[%s1056_s1] sm:$0xff]   ;;  %v892_v2 = vld [vmem:[%s1058_s3 + $0x38] sm:$0xff]   ;;  %s1064_s28 = smov (!%p271_p3, %s761_s28), 31  ;;  %vm318_vm0 = vcmask 261120  }
   0xc   : > { %822 = vmatprep.subr.bf16.mxu0 %v890_v0  ;;  %v893_v3 = vld [vmem:[%s1058_s3 + $0x30] sm:$0xff]   ;;  %834 = vmatprep.subr.bf16.mxu1 %v892_v2  ;;  %s762_s12 = sshll.u32 %s1064_s28, 3  ;;  %v894_v4 = vld [vmem:[%s1058_s3 + $0x28] sm:$0xff]   ;;  %v895_v14 = vld [vmem:[%s1058_s3 + $0x20] sm:$0xff]  }
   0xd   : > { %823 = vmatpush3.bf16.msra.mxu0 %v890_v0  ;;  %835 = vmatpush3.bf16.msra.mxu1 %v892_v2  ;;  %s274_s15 = scalar_lea.vmem %s1055_s0, %s762_s12  ;;  %v896_v17 = vld [vmem:[%s1058_s3 + $0x18] sm:$0xff]   ;;  %v897_v19 = vld [vmem:[%s1058_s3 + $0x10] sm:$0xff]   ;;  %v898_v20 = vld [vmem:[%s1058_s3 + $0x8] sm:$0xff]   ;;  %s280_s11 = scalar_lea.vmem %s1062_s7, %s762_s12 }
   0xe   : > { %824 = vmatprep.subr.bf16.mxu0 %v891_v1  ;;  %836 = vmatprep.subr.bf16.mxu1 %v893_v3  ;;  %v283_v5 = vld [vmem:[%s274_s15] sm:$0xff]  ;;  %v284_v6 = vld [vmem:[%s274_s15 + $0x8] sm:$0xff]  ;;  %v285_v7 = vld [vmem:[%s274_s15 + $0x10] sm:$0xff] }
   0xf   : > { %v291_v8 = vpack.c.bf16 %v284_v6, %v283_v5  ;;  %v286_v9 = vld [vmem:[%s274_s15 + $0x18] sm:$0xff]  ;;  %v287_v10 = vld [vmem:[%s274_s15 + $0x20] sm:$0xff]  ;;  %v288_v11 = vld [vmem:[%s274_s15 + $0x28] sm:$0xff] }
  0x10   : > { %v292_v12 = vpack.c.bf16 %v286_v9, %v285_v7  ;;  %v293_v13 = vpack.c.bf16 %v288_v11, %v287_v10  ;;  %v289_v15 = vld [vmem:[%s274_s15 + $0x30] sm:$0xff]  ;;  %v290_v16 = vld [vmem:[%s274_s15 + $0x38] sm:$0xff]  ;;  %v899_v21 = vld [vmem:[%s1058_s3] sm:$0xff]  }
  0x11   : > { %825 = vmatpush3.bf16.msra.mxu0 %v891_v1  ;;  %837 = vmatpush3.bf16.msra.mxu1 %v893_v3  ;;  %v294_v18 = vpack.c.bf16 %v290_v16, %v289_v15  ;;  %v900_v22 = vld [vmem:[%s1060_s5 + $0x38] sm:$0xff]   ;;  %v901_v23 = vld [vmem:[%s1060_s5 + $0x30] sm:$0xff]   ;;  %v902_v24 = vld [vmem:[%s1060_s5 + $0x28] sm:$0xff]  }
  0x12   : > { %826 = vmatprep.mubr.msk.bf16.mxu0 %vm318_vm0, %v291_v8  ;;  %838 = vmatprep.subr.bf16.mxu1 %v894_v4  ;;  %v903_v25 = vld [vmem:[%s1060_s5 + $0x20] sm:$0xff]   ;;  %v904_v26 = vld [vmem:[%s1060_s5 + $0x18] sm:$0xff]   ;;  %v905_v56 = vld [vmem:[%s1060_s5 + $0x10] sm:$0xff]  }
  0x13   : > { %858 = vmatprep.subr.bf16.mxu0 %v900_v22  ;;  %v765_v29 = vld [vmem:[%s1057_s2] ss:$0 sm:$0xff]  ;;  %v906_v57 = vld [vmem:[%s1060_s5 + $0x8] sm:$0xff]  }
  0x14   : > { %827 = vmatmul.mubr.msk.bf16.vlgmr.msra.gmra.mxu0 %vm318_vm0, %v292_v12  ;;  %v907_v58 = vld [vmem:[%s1060_s5] sm:$0xff]  }
  0x15   : > { %830 = vmatprep.mubr.msk.bf16.mxu0 %vm318_vm0, %v293_v13  ;;  %839 = vmatpush3.bf16.msra.mxu1 %v894_v4  ;;  %v772_v61 = vld [vmem:[%s1059_s4] ss:$0 sm:$0xff] }
  0x16   : > { %840 = vmatprep.subr.bf16.mxu1 %v895_v14  ;;  %859 = vmatpush3.bf16.msra.mxu0 %v900_v22 }
  0x17   : > { %860 = vmatprep.subr.bf16.mxu0 %v901_v23 }
  0x19   : > { %841 = vmatpush3.bf16.msra.mxu1 %v895_v14 }
  0x1a   : > { %842 = vmatprep.subr.bf16.mxu1 %v896_v17  ;;  %861 = vmatpush3.bf16.msra.mxu0 %v901_v23 }
  0x1b   : > { %862 = vmatprep.subr.bf16.mxu0 %v902_v24 }
  0x1c   : > { %831 = vmatmul.mubr.msk.bf16.gmra.mxu0 %vm318_vm0, %v294_v18 }
  0x1d   : > { %843 = vmatpush3.bf16.msra.mxu1 %v896_v17 }
  0x1e   : > { %844 = vmatprep.subr.bf16.mxu1 %v897_v19  ;;  %863 = vmatpush3.bf16.msra.mxu0 %v902_v24  ;;  %v781_v24 = vld [vmem:[%s1061_s6] ss:$0 sm:$0xff] }
  0x1f   : > { %864 = vmatprep.subr.bf16.mxu0 %v903_v25 }
  0x21   : > { %845 = vmatpush3.bf16.msra.mxu1 %v897_v19 }
  0x22   : > { %846 = vmatprep.subr.bf16.mxu1 %v898_v20  ;;  %865 = vmatpush3.bf16.msra.mxu0 %v903_v25 }
  0x23   : > { %866 = vmatprep.subr.bf16.mxu0 %v904_v26 }
  0x25   : > { %847 = vmatpush3.bf16.msra.mxu1 %v898_v20 }
  0x26   : > { %848 = vmatprep.subr.bf16.mxu1 %v899_v21  ;;  %867 = vmatpush3.bf16.msra.mxu0 %v904_v26 }
  0x27   : > { %868 = vmatprep.subr.bf16.mxu0 %v905_v56 }
  0x29   : > { %849 = vmatpush3.bf16.msra.mxu1 %v899_v21 }
  0x2a   : > { %869 = vmatpush3.bf16.msra.mxu0 %v905_v56 }
  0x2b   : > { %870 = vmatprep.subr.bf16.mxu0 %v906_v57 }
  0x2e   : > { %871 = vmatpush3.bf16.msra.mxu0 %v906_v57 }
  0x2f   : > { %872 = vmatprep.subr.bf16.mxu0 %v907_v58 }
  0x32   : > { %873 = vmatpush3.bf16.msra.mxu0 %v907_v58 }
  0xd4   : > { %v828_v27 = vpop.f32.mrf.mxu0 }
  0xd5   : > { %v374_v33 = vadd.f32 %v828_v27, %v765_v29 }
  0xd6   : > { %v365_v28 = vpop.f32.mrf.mxu0 }
  0xd7   : > { %v366_v31 = vadd.f32 %v765_v29, %v365_v28  ;;  %v398_v40 = vmax.f32 %v374_v33, 0.0 }
  0xd8   : > { %v829_v30 = vpop.f32.mrf.mxu0 }
  0xd9   : > { %v377_v32 = vadd.f32 %v829_v30, %v765_v29  ;;  %v396_v38 = vmax.f32 %v366_v31, 0.0 }
  0xda   : > { %v368_v34 = vpop.f32.mrf.mxu0 }
  0xdb   : > { %v369_v35 = vadd.f32 %v765_v29, %v368_v34  ;;  %v399_v36 = vmax.f32 %v377_v32, 0.0 }
  0xdc   : > { %v832_v37 = vpop.f32.mrf.mxu0 }
  0xdd   : > { %v397_v39 = vmax.f32 %v369_v35, 0.0  ;;  %v405_v43 = vpack.c.bf16 %v399_v36, %v398_v40  ;;  %v390_v47 = vadd.f32 %v832_v37, %v765_v29 }
  0xde   : > { %v381_v41 = vpop.f32.mrf.mxu0 }
  0xdf   : > { %v404_v42 = vpack.c.bf16 %v397_v39, %v396_v38  ;;  %v382_v45 = vadd.f32 %v765_v29, %v381_v41  ;;  %v402_v53 = vmax.f32 %v390_v47, 0.0 }
  0xe0   : > { %v833_v44 = vpop.f32.mrf.mxu0 }
  0xe1   : > { %v393_v46 = vadd.f32 %v833_v44, %v765_v29  ;;  %850 = vmatprep.mubr.bf16.mxu1 %v404_v42  ;;  %v400_v51 = vmax.f32 %v382_v45, 0.0 }
  0xe2   : > { %v384_v48 = vpop.f32.mrf.mxu0  ;;  %851 = vmatmul.mubr.bf16.vlgmr.msra.gmra.mxu1 %v405_v43 }
  0xe3   : > { %v385_v49 = vadd.f32 %v765_v29, %v384_v48  ;;  %v403_v50 = vmax.f32 %v393_v46, 0.0 }
  0xe5   : > { %v401_v52 = vmax.f32 %v385_v49, 0.0  ;;  %v407_v55 = vpack.c.bf16 %v403_v50, %v402_v53 }
  0xe7   : > { %v406_v54 = vpack.c.bf16 %v401_v52, %v400_v51 }
  0xe9   : > { %854 = vmatprep.mubr.bf16.mxu1 %v406_v54 }
  0xea   : > { %855 = vmatmul.mubr.bf16.gmra.mxu1 %v407_v55 }
 0x1a2   : > { %v852_v59 = vpop.f32.mrf.mxu1 }
 0x1a3   : > { %v522_v1 = vadd.f32 %v852_v59, %v772_v61 }
 0x1a4   : > { %v513_v60 = vpop.f32.mrf.mxu1 }
 0x1a5   : > { %v514_v63 = vadd.f32 %v772_v61, %v513_v60  ;;  %v546_v8 = vmax.f32 %v522_v1, 0.0 }
 0x1a6   : > { %v853_v62 = vpop.f32.mrf.mxu1 }
 0x1a7   : > { %v525_v0 = vadd.f32 %v853_v62, %v772_v61  ;;  %v544_v6 = vmax.f32 %v514_v63, 0.0 }
 0x1a8   : > { %v516_v2 = vpop.f32.mrf.mxu1 }
 0x1a9   : > { %v517_v3 = vadd.f32 %v772_v61, %v516_v2  ;;  %v547_v4 = vmax.f32 %v525_v0, 0.0 }
 0x1aa   : > { %v856_v5 = vpop.f32.mrf.mxu1 }
 0x1ab   : > { %v545_v7 = vmax.f32 %v517_v3, 0.0  ;;  %v553_v11 = vpack.c.bf16 %v547_v4, %v546_v8  ;;  %v538_v15 = vadd.f32 %v856_v5, %v772_v61 }
 0x1ac   : > { %v529_v9 = vpop.f32.mrf.mxu1 }
 0x1ad   : > { %v552_v10 = vpack.c.bf16 %v545_v7, %v544_v6  ;;  %v530_v13 = vadd.f32 %v772_v61, %v529_v9  ;;  %v550_v21 = vmax.f32 %v538_v15, 0.0 }
 0x1ae   : > { %v857_v12 = vpop.f32.mrf.mxu1 }
 0x1af   : > { %v541_v14 = vadd.f32 %v857_v12, %v772_v61  ;;  %874 = vmatprep.mubr.bf16.mxu0 %v552_v10  ;;  %v548_v19 = vmax.f32 %v530_v13, 0.0 }
 0x1b0   : > { %v532_v16 = vpop.f32.mrf.mxu1  ;;  %875 = vmatmul.mubr.bf16.vlgmr.msra.gmra.mxu0 %v553_v11 }
 0x1b1   : > { %v533_v17 = vadd.f32 %v772_v61, %v532_v16  ;;  %v551_v18 = vmax.f32 %v541_v14, 0.0 }
 0x1b3   : > { %v549_v20 = vmax.f32 %v533_v17, 0.0  ;;  %v555_v23 = vpack.c.bf16 %v551_v18, %v550_v21 }
 0x1b5   : > { %v554_v22 = vpack.c.bf16 %v549_v20, %v548_v19 }
 0x1b7   : > { %878 = vmatprep.mubr.bf16.mxu0 %v554_v22 }
 0x1b8   : > { %879 = vmatmul.mubr.bf16.gmra.mxu0 %v555_v23 }
 0x270   : > { %v876_v25 = vpop.f32.mrf.mxu0 }
 0x271   : > { %v670_v26 = vadd.f32 %v876_v25, %v781_v24 }
 0x272   : > { %v661_v27 = vpop.f32.mrf.mxu0 }
 0x273   : > { %694 = vst.msk [vmem:[%s280_s11 + $0x10] sm:$0xff] %vm318_vm0, %v670_v26  ;;  %v662_v28 = vadd.f32 %v781_v24, %v661_v27 }
 0x274   : > { %v877_v29 = vpop.f32.mrf.mxu0 }
 0x275   : > { %692 = vst.msk [vmem:[%s280_s11] sm:$0xff] %vm318_vm0, %v662_v28  ;;  %v673_v30 = vadd.f32 %v877_v29, %v781_v24 }
 0x276   : > { %v664_v31 = vpop.f32.mrf.mxu0 }
 0x277   : > { %695 = vst.msk [vmem:[%s280_s11 + $0x18] sm:$0xff] %vm318_vm0, %v673_v30  ;;  %v665_v32 = vadd.f32 %v781_v24, %v664_v31 }
 0x278   : > { %v880_v33 = vpop.f32.mrf.mxu0 }
 0x279   : > { %693 = vst.msk [vmem:[%s280_s11 + $0x8] sm:$0xff] %vm318_vm0, %v665_v32  ;;  %v686_v34 = vadd.f32 %v880_v33, %v781_v24 }
 0x27a   : > { %v677_v35 = vpop.f32.mrf.mxu0 }
 0x27b   : > { %698 = vst.msk [vmem:[%s280_s11 + $0x30] sm:$0xff] %vm318_vm0, %v686_v34  ;;  %v678_v36 = vadd.f32 %v781_v24, %v677_v35 }
 0x27c   : > { %v881_v37 = vpop.f32.mrf.mxu0 }
 0x27d   : > { %696 = vst.msk [vmem:[%s280_s11 + $0x20] sm:$0xff] %vm318_vm0, %v678_v36  ;;  %v689_v38 = vadd.f32 %v881_v37, %v781_v24 }
 0x27e   : > { %v680_v39 = vpop.f32.mrf.mxu0 }
 0x27f   : > { %699 = vst.msk [vmem:[%s280_s11 + $0x38] sm:$0xff] %vm318_vm0, %v689_v38  ;;  %v681_v40 = vadd.f32 %v781_v24, %v680_v39 }
 0x281   : > { %697 = vst.msk [vmem:[%s280_s11 + $0x28] sm:$0xff] %vm318_vm0, %v681_v40 }
 0x282 PF: > { %s17_s24 = sadd.s32 1, %s914_s24  }
 0x283   : > { %p14_p4 = scmp.ge.s32.totalorder %s17_s24, 6  }
 0x285   :  { %16 = sbr.rel (!%p14_p4) target bundleno = 1 (0x1), region = 78 }

</bundles_post_ra>
